<compile_context>
chip_gen: v7x
topology: tpu7x:2x2x1
jax: 0.10.0
libtpu: 0.0.40
codegen_flags: <defaults>
</compile_context>

<pallas_src>
import functools

import jax
import jax.numpy as jnp
from jax import lax
from jax.experimental import pallas as pl
from jax.experimental.pallas import tpu as pltpu  # noqa: F401  (kept for TPU-specific tuning)


# ------------------------------ fused kernel -------------------------------- #

def _combine_kernel(xcat_ref, pw_ref, pwb_ref, gamma_ref, beta_ref, o_ref,
                    *, eps, inv_count, batch):
    """(pre-concatenated) -> [dw folded] pointwise 1x1 -> LayerNorm([C,H,W])."""
    pw = pw_ref[...]          # (C, C)  folded pointwise weight (Cin, Cout)
    pwb = pwb_ref[...]        # (1, C)  folded pointwise bias
    gamma = gamma_ref[...]    # (N, C)  LayerNorm affine, token-major
    beta = beta_ref[...]      # (N, C)

    # Static unrolled loop over batch (B is tiny); iterations are independent so the
    # scheduler can overlap the MXU pass of one with the LN reductions of the other.
    for b in range(batch):
        # pointwise 1x1 conv (depthwise conv pre-folded into pw / pwb)
        z = jnp.dot(xcat_ref[b], pw, preferred_element_type=jnp.float32) + pwb  # (N, C)

        # LayerNorm over (C, H, W) == all N*C elements of this sample.
        # One-pass: sum and sum-of-squares reduce concurrently (no serialization
        # through the mean); var = E[z^2] - mean^2 is fine in f32 at 6272 elements.
        row_s = jnp.sum(z, axis=1, keepdims=True)                  # (N, 1) lane reduce
        row_q = jnp.sum(z * z, axis=1, keepdims=True)              # (N, 1)
        mean = jnp.sum(row_s, axis=0, keepdims=True) * inv_count   # (1, 1) sublane reduce
        ex2 = jnp.sum(row_q, axis=0, keepdims=True) * inv_count    # (1, 1)
        inv_std = lax.rsqrt(ex2 - mean * mean + eps)               # EUP slot

        o_ref[b] = (z - mean) * inv_std * gamma + beta


def combine_block_forward(x, y, fparams):
    """x, y: NCHW float32. Returns NCHW float32 of shape (B, Cx+Cy, H, W)."""
    B, Cx, H, W = x.shape
    Cy = y.shape[1]
    C = Cx + Cy
    N = H * W

    # Boundary layout change: fuse the channel concat into the NCHW -> token-major
    # transpose (single XLA fusion; activations are tiny). Channels land on lanes.
    xcat = jnp.concatenate(
        [jnp.transpose(x, (0, 2, 3, 1)), jnp.transpose(y, (0, 2, 3, 1))],
        axis=-1).reshape(B, N, C)

    kernel = functools.partial(_combine_kernel,
                               eps=1e-5, inv_count=1.0 / (N * C), batch=B)

    out_tok = pl.pallas_call(
        kernel,
        out_shape=jax.ShapeDtypeStruct((B, N, C), jnp.float32),
        grid=(1,),  # single invocation: no per-grid-step overhead, whole block fused
        in_specs=[
            pl.BlockSpec((B, N, C), lambda i: (0, 0, 0)),   # concatenated activations
            pl.BlockSpec((C, C), lambda i: (0, 0)),         # folded pointwise weight
            pl.BlockSpec((1, C), lambda i: (0, 0)),         # folded pointwise bias
            pl.BlockSpec((N, C), lambda i: (0, 0)),         # LayerNorm gamma (token-major)
            pl.BlockSpec((N, C), lambda i: (0, 0)),         # LayerNorm beta  (token-major)
        ],
        out_specs=pl.BlockSpec((B, N, C), lambda i: (0, 0, 0)),
    )(xcat, fparams['pw_w'], fparams['pw_b'],
      fparams['gamma_tok'], fparams['beta_tok'])

    return out_tok.reshape(B, H, W, C).transpose(0, 3, 1, 2)  # back to NCHW


# ------------------------------- parameters --------------------------------- #

def make_params(x_ch, y_ch, H, W, key):
    """Raw torch-equivalent parameters."""
    C = x_ch + y_ch
    ks = jax.random.split(key, 6)
    dw_w = jax.random.normal(ks[0], (1, C), jnp.float32) * 0.5 + 1.0   # depthwise 1x1 weight
    dw_b = jax.random.normal(ks[1], (1, C), jnp.float32) * 0.1         # depthwise bias
    pw_w = jax.random.normal(ks[2], (C, C), jnp.float32) / jnp.sqrt(C)  # (Cin, Cout) layout
    pw_b = jax.random.normal(ks[3], (1, C), jnp.float32) * 0.1
    gamma = jax.random.normal(ks[4], (C, H, W), jnp.float32) * 0.1 + 1.0
    beta = jax.random.normal(ks[5], (C, H, W), jnp.float32) * 0.1
    return dict(dw_w=dw_w, dw_b=dw_b, pw_w=pw_w, pw_b=pw_b, gamma=gamma, beta=beta)


def fold_params(params, H, W):
    """One-time parameter prep: fold the depthwise 1x1 conv (diagonal matrix) into the
    pointwise conv, and pre-transpose the LayerNorm affine to token-major layout."""
    pw_w = params['pw_w'] * params['dw_w'][0][:, None]        # row-scale: diag(dw_w) @ W
    pw_b = params['pw_b'] + params['dw_b'] @ params['pw_w']   # W^T dw_b + pw_b  -> (1, C)
    gamma_tok = jnp.transpose(params['gamma'], (1, 2, 0)).reshape(H * W, -1)
    beta_tok = jnp.transpose(params['beta'], (1, 2, 0)).reshape(H * W, -1)
    return dict(pw_w=pw_w, pw_b=pw_b, gamma_tok=gamma_tok, beta_tok=beta_tok)


# ------------------------------- reference ----------------------------------- #

def reference(x, y, params):
    cat = jnp.concatenate([x, y], axis=1)
    dw = cat * params['dw_w'][0][None, :, None, None] + params['dw_b'][0][None, :, None, None]
    pw = jnp.einsum('bihw,io->bohw', dw, params['pw_w'],
                    precision=lax.Precision.HIGHEST) + params['pw_b'][0][None, :, None, None]
    mean = jnp.mean(pw, axis=(1, 2, 3), keepdims=True)
    var = jnp.mean((pw - mean) ** 2, axis=(1, 2, 3), keepdims=True)
    norm = (pw - mean) * lax.rsqrt(var + 1e-5)
    return norm * params['gamma'][None] + params['beta'][None]


# ---------------------------------- main ------------------------------------- #

if __name__ == "__main__":
    # LayerNorm([out_channel, 7, 7]) fixes spatial = 7x7; pick x_ch = y_ch = 64
    # so out_channel = 128 (exactly one lane width -> lane-dense loads/stores).
    B, x_ch, y_ch = 2, 64, 64
    H = W = 7

    key = jax.random.PRNGKey(0)
    kx, ky, kp = jax.random.split(key, 3)
    x = jax.random.normal(kx, (B, x_ch, H, W), jnp.float32)
    y = jax.random.normal(ky, (B, y_ch, H, W), jnp.float32)
    params = make_params(x_ch, y_ch, H, W, kp)
    fparams = fold_params(params, H, W)   # one-time prep: dw fold + token-major affine

    fwd = jax.jit(combine_block_forward)
    out = jax.block_until_ready(fwd(x, y, fparams))
    ref = jax.block_until_ready(reference(x, y, params))

    assert out.shape == (B, x_ch + y_ch, H, W) and out.dtype == jnp.float32
    assert bool(jnp.all(jnp.isfinite(out)))
    assert bool(jnp.allclose(out, ref, atol=1e-2, rtol=1e-2))
    print("KERNEL_OK")
</pallas_src>

<mosaic_0001>
module attributes {stable_mosaic.version = 11 : i64} {
  func.func @_combine_kernel(%arg0: i32, %arg1: memref<2x49x128xf32, #tpu.memory_space<vmem>>, %arg2: memref<128x128xf32, #tpu.memory_space<vmem>>, %arg3: memref<1x128xf32, #tpu.memory_space<vmem>>, %arg4: memref<49x128xf32, #tpu.memory_space<vmem>>, %arg5: memref<49x128xf32, #tpu.memory_space<vmem>>, %arg6: memref<2x49x128xf32, #tpu.memory_space<vmem>>) attributes {dimension_semantics = [#tpu.dimension_semantics<arbitrary>], iteration_bounds = array<i64: 1>, scalar_prefetch = 0 : i64, scratch_operands = 0 : i64, tpu.core_type = #tpu.core_type<tc>, window_params = [{pipeline_mode = #tpu.pipeline_mode<synchronous>, transform_indices = @transform_0, window_bounds = array<i64: 2, 49, 128>}, {pipeline_mode = #tpu.pipeline_mode<synchronous>, transform_indices = @transform_1, window_bounds = array<i64: 128, 128>}, {pipeline_mode = #tpu.pipeline_mode<synchronous>, transform_indices = @transform_2, window_bounds = array<i64: 1, 128>}, {pipeline_mode = #tpu.pipeline_mode<synchronous>, transform_indices = @transform_3, window_bounds = array<i64: 49, 128>}, {pipeline_mode = #tpu.pipeline_mode<synchronous>, transform_indices = @transform_4, window_bounds = array<i64: 49, 128>}, {pipeline_mode = #tpu.pipeline_mode<synchronous>, transform_indices = @transform_5, window_bounds = array<i64: 2, 49, 128>}]} {
    %c0 = arith.constant 0 : index
    %c0_0 = arith.constant 0 : index
    %0 = vector.load %arg2[%c0, %c0_0] : memref<128x128xf32, #tpu.memory_space<vmem>>, vector<128x128xf32>
    %c0_1 = arith.constant 0 : index
    %c0_2 = arith.constant 0 : index
    %1 = vector.load %arg3[%c0_1, %c0_2] : memref<1x128xf32, #tpu.memory_space<vmem>>, vector<1x128xf32>
    %c0_3 = arith.constant 0 : index
    %c0_4 = arith.constant 0 : index
    %2 = vector.load %arg4[%c0_3, %c0_4] : memref<49x128xf32, #tpu.memory_space<vmem>>, vector<49x128xf32>
    %c0_5 = arith.constant 0 : index
    %c0_6 = arith.constant 0 : index
    %3 = vector.load %arg5[%c0_5, %c0_6] : memref<49x128xf32, #tpu.memory_space<vmem>>, vector<49x128xf32>
    %c0_7 = arith.constant 0 : index
    %c0_8 = arith.constant 0 : index
    %c0_9 = arith.constant 0 : index
    %4 = vector.load %arg1[%c0_7, %c0_8, %c0_9] : memref<2x49x128xf32, #tpu.memory_space<vmem>>, vector<1x49x128xf32>
    %5 = vector.shape_cast %4 : vector<1x49x128xf32> to vector<49x128xf32>
    %cst = arith.constant dense<0.000000e+00> : vector<49x128xf32>
    %6 = tpu.matmul %5, %0, %cst {dimension_numbers = #tpu.dot_dimension_numbers<[1], [0], [0], [1], [0, 0, 1, 1], [], []>} : vector<49x128xf32>, vector<128x128xf32>, vector<49x128xf32> -> vector<49x128xf32>
    %7 = vector.broadcast %1 : vector<1x128xf32> to vector<49x128xf32>
    %8 = arith.addf %6, %7 : vector<49x128xf32>
    %cst_10 = arith.constant dense<0.000000e+00> : vector<49xf32>
    %9 = vector.multi_reduction <add>, %8, %cst_10 [1] : vector<49x128xf32> to vector<49xf32>
    %10 = vector.shape_cast %9 : vector<49xf32> to vector<49x1xf32>
    %11 = arith.mulf %8, %8 : vector<49x128xf32>
    %cst_11 = arith.constant dense<0.000000e+00> : vector<49xf32>
    %12 = vector.multi_reduction <add>, %11, %cst_11 [1] : vector<49x128xf32> to vector<49xf32>
    %13 = vector.shape_cast %12 : vector<49xf32> to vector<49x1xf32>
    %cst_12 = arith.constant dense<0.000000e+00> : vector<1xf32>
    %14 = vector.multi_reduction <add>, %10, %cst_12 [0] : vector<49x1xf32> to vector<1xf32>
    %15 = vector.shape_cast %14 : vector<1xf32> to vector<1x1xf32>
    %cst_13 = arith.constant 1.59438772E-4 : f32
    %16 = vector.broadcast %cst_13 : f32 to vector<1x1xf32>
    %17 = arith.mulf %15, %16 : vector<1x1xf32>
    %cst_14 = arith.constant dense<0.000000e+00> : vector<1xf32>
    %18 = vector.multi_reduction <add>, %13, %cst_14 [0] : vector<49x1xf32> to vector<1xf32>
    %19 = vector.shape_cast %18 : vector<1xf32> to vector<1x1xf32>
    %cst_15 = arith.constant 1.59438772E-4 : f32
    %20 = vector.broadcast %cst_15 : f32 to vector<1x1xf32>
    %21 = arith.mulf %19, %20 : vector<1x1xf32>
    %22 = arith.mulf %17, %17 : vector<1x1xf32>
    %23 = arith.subf %21, %22 : vector<1x1xf32>
    %cst_16 = arith.constant 9.99999974E-6 : f32
    %24 = vector.broadcast %cst_16 : f32 to vector<1x1xf32>
    %25 = arith.addf %23, %24 : vector<1x1xf32>
    %26 = math.rsqrt %25 : vector<1x1xf32>
    %27 = vector.broadcast %17 : vector<1x1xf32> to vector<49x128xf32>
    %28 = arith.subf %8, %27 : vector<49x128xf32>
    %29 = vector.broadcast %26 : vector<1x1xf32> to vector<49x128xf32>
    %30 = arith.mulf %28, %29 : vector<49x128xf32>
    %31 = arith.mulf %30, %2 : vector<49x128xf32>
    %32 = arith.addf %31, %3 : vector<49x128xf32>
    %c0_17 = arith.constant 0 : index
    %c0_18 = arith.constant 0 : index
    %c0_19 = arith.constant 0 : index
    %33 = vector.load %arg6[%c0_17, %c0_18, %c0_19] : memref<2x49x128xf32, #tpu.memory_space<vmem>>, vector<1x49x128xf32>
    %34 = vector.shape_cast %33 : vector<1x49x128xf32> to vector<49x128xf32>
    %35 = vector.shape_cast %32 : vector<49x128xf32> to vector<1x49x128xf32>
    tpu.vector_store %arg6[%c0_17, %c0_18, %c0_19], %35 {strides = array<i32>} : memref<2x49x128xf32, #tpu.memory_space<vmem>>, vector<1x49x128xf32>,
    %c1 = arith.constant 1 : index
    %c0_20 = arith.constant 0 : index
    %c0_21 = arith.constant 0 : index
    %36 = vector.load %arg1[%c1, %c0_20, %c0_21] : memref<2x49x128xf32, #tpu.memory_space<vmem>>, vector<1x49x128xf32>
    %37 = vector.shape_cast %36 : vector<1x49x128xf32> to vector<49x128xf32>
    %cst_22 = arith.constant dense<0.000000e+00> : vector<49x128xf32>
    %38 = tpu.matmul %37, %0, %cst_22 {dimension_numbers = #tpu.dot_dimension_numbers<[1], [0], [0], [1], [0, 0, 1, 1], [], []>} : vector<49x128xf32>, vector<128x128xf32>, vector<49x128xf32> -> vector<49x128xf32>
    %39 = vector.broadcast %1 : vector<1x128xf32> to vector<49x128xf32>
    %40 = arith.addf %38, %39 : vector<49x128xf32>
    %cst_23 = arith.constant dense<0.000000e+00> : vector<49xf32>
    %41 = vector.multi_reduction <add>, %40, %cst_23 [1] : vector<49x128xf32> to vector<49xf32>
    %42 = vector.shape_cast %41 : vector<49xf32> to vector<49x1xf32>
    %43 = arith.mulf %40, %40 : vector<49x128xf32>
    %cst_24 = arith.constant dense<0.000000e+00> : vector<49xf32>
    %44 = vector.multi_reduction <add>, %43, %cst_24 [1] : vector<49x128xf32> to vector<49xf32>
    %45 = vector.shape_cast %44 : vector<49xf32> to vector<49x1xf32>
    %cst_25 = arith.constant dense<0.000000e+00> : vector<1xf32>
    %46 = vector.multi_reduction <add>, %42, %cst_25 [0] : vector<49x1xf32> to vector<1xf32>
    %47 = vector.shape_cast %46 : vector<1xf32> to vector<1x1xf32>
    %cst_26 = arith.constant 1.59438772E-4 : f32
    %48 = vector.broadcast %cst_26 : f32 to vector<1x1xf32>
    %49 = arith.mulf %47, %48 : vector<1x1xf32>
    %cst_27 = arith.constant dense<0.000000e+00> : vector<1xf32>
    %50 = vector.multi_reduction <add>, %45, %cst_27 [0] : vector<49x1xf32> to vector<1xf32>
    %51 = vector.shape_cast %50 : vector<1xf32> to vector<1x1xf32>
    %cst_28 = arith.constant 1.59438772E-4 : f32
    %52 = vector.broadcast %cst_28 : f32 to vector<1x1xf32>
    %53 = arith.mulf %51, %52 : vector<1x1xf32>
    %54 = arith.mulf %49, %49 : vector<1x1xf32>
    %55 = arith.subf %53, %54 : vector<1x1xf32>
    %cst_29 = arith.constant 9.99999974E-6 : f32
    %56 = vector.broadcast %cst_29 : f32 to vector<1x1xf32>
    %57 = arith.addf %55, %56 : vector<1x1xf32>
    %58 = math.rsqrt %57 : vector<1x1xf32>
    %59 = vector.broadcast %49 : vector<1x1xf32> to vector<49x128xf32>
    %60 = arith.subf %40, %59 : vector<49x128xf32>
    %61 = vector.broadcast %58 : vector<1x1xf32> to vector<49x128xf32>
    %62 = arith.mulf %60, %61 : vector<49x128xf32>
    %63 = arith.mulf %62, %2 : vector<49x128xf32>
    %64 = arith.addf %63, %3 : vector<49x128xf32>
    %c1_30 = arith.constant 1 : index
    %c0_31 = arith.constant 0 : index
    %c0_32 = arith.constant 0 : index
    %65 = vector.load %arg6[%c1_30, %c0_31, %c0_32] : memref<2x49x128xf32, #tpu.memory_space<vmem>>, vector<1x49x128xf32>
    %66 = vector.shape_cast %65 : vector<1x49x128xf32> to vector<49x128xf32>
    %67 = vector.shape_cast %64 : vector<49x128xf32> to vector<1x49x128xf32>
    tpu.vector_store %arg6[%c1_30, %c0_31, %c0_32], %67 {strides = array<i32>} : memref<2x49x128xf32, #tpu.memory_space<vmem>>, vector<1x49x128xf32>,
    return
  }
  func.func @transform_0(%arg0: i32) -> (i32, i32, i32) {
    %c0_i32 = arith.constant 0 : i32
    %c0_i32_0 = arith.constant 0 : i32
    %c0_i32_1 = arith.constant 0 : i32
    %c0_i32_2 = arith.constant 0 : i32
    return %c0_i32, %c0_i32_0, %c0_i32_1 : i32, i32, i32
  }
  func.func @transform_1(%arg0: i32) -> (i32, i32) {
    %c0_i32 = arith.constant 0 : i32
    %c0_i32_0 = arith.constant 0 : i32
    %c0_i32_1 = arith.constant 0 : i32
    return %c0_i32, %c0_i32_0 : i32, i32
  }
  func.func @transform_2(%arg0: i32) -> (i32, i32) {
    %c0_i32 = arith.constant 0 : i32
    %c0_i32_0 = arith.constant 0 : i32
    %c0_i32_1 = arith.constant 0 : i32
    return %c0_i32, %c0_i32_0 : i32, i32
  }
  func.func @transform_3(%arg0: i32) -> (i32, i32) {
    %c0_i32 = arith.constant 0 : i32
    %c0_i32_0 = arith.constant 0 : i32
    %c0_i32_1 = arith.constant 0 : i32
    return %c0_i32, %c0_i32_0 : i32, i32
  }
  func.func @transform_4(%arg0: i32) -> (i32, i32) {
    %c0_i32 = arith.constant 0 : i32
    %c0_i32_0 = arith.constant 0 : i32
    %c0_i32_1 = arith.constant 0 : i32
    return %c0_i32, %c0_i32_0 : i32, i32
  }
  func.func @transform_5(%arg0: i32) -> (i32, i32, i32) {
    %c0_i32 = arith.constant 0 : i32
    %c0_i32_0 = arith.constant 0 : i32
    %c0_i32_1 = arith.constant 0 : i32
    %c0_i32_2 = arith.constant 0 : i32
    return %c0_i32, %c0_i32_0, %c0_i32_1 : i32, i32, i32
  }
}

</mosaic_0001>

<bundles_post_ra>
// kernel: combine_block_forward.1
= control target key start
LH: loop header
LB: loop body
LE: loop exit
PB: predicated region body
PF: predicated region fallthrough
CT: control target
= control target key end

     0   :  { %v708_v0 = vmov 0.0|0.0   ;;  %vm709_vm0 = vmmov 0   ;;  %v710_v6 = vmov 0.0   ;;  %vm176_vm1 = vcmask 1040384   ;;  %s1065_s1 = inlined_call_operand.vmem [shape: f32[128,128], index: 1, kind: input, shape index: {}]   ;;  %s1066_s0 = inlined_call_operand.vmem [shape: f32[2,49,128], index: 0, kind: input, shape index: {}]   ;;  %s1067_s2 = inlined_call_operand.vmem [shape: f32[1,128], index: 2, kind: input, shape index: {}]   ;;  %s1068_s3 = inlined_call_operand.vmem [shape: f32[49,128], index: 3, kind: input, shape index: {}]   ;;  %s1069_s4 = inlined_call_operand.vmem [shape: f32[49,128], index: 4, kind: input, shape index: {}]   ;;  %s1070_s5 = inlined_call_operand.vmem [shape: f32[2,49,128], index: 5, kind: output, shape index: {}]  }
   0x1   :  { %653 = vmatprep.subr.bf16.mxu0 %v708_v0  ;;  %677 = vmatprep.subr.bf16.mxu1 %v708_v0  ;;  %v20_v1 = vld [vmem:[%s1065_s1] sm:$0xff]  ;;  %v21_v2 = vld [vmem:[%s1065_s1 + $0x8] sm:$0xff]  ;;  %v22_v3 = vld [vmem:[%s1065_s1 + $0x10] sm:$0xff] }
   0x2   :  { %v654_v4 = vpack.c.bf16 %v21_v2, %v20_v1  ;;  %v23_v5 = vld [vmem:[%s1065_s1 + $0x18] sm:$0xff]  ;;  %579 = vmatprep.mubr.msk.f32.mxu0 %vm709_vm0, %v710_v6  ;;  %632 = vmatprep.mubr.msk.f32.mxu1 %vm709_vm0, %v710_v6  ;;  %v24_v8 = vld [vmem:[%s1065_s1 + $0x20] sm:$0xff]  ;;  %v25_v9 = vld [vmem:[%s1065_s1 + $0x28] sm:$0xff] }
   0x3   :  { %v657_v7 = vpack.c.bf16 %v23_v5, %v22_v3  ;;  %v660_v10 = vpack.c.bf16 %v25_v9, %v24_v8  ;;  %v26_v11 = vld [vmem:[%s1065_s1 + $0x30] sm:$0xff]  ;;  %v27_v12 = vld [vmem:[%s1065_s1 + $0x38] sm:$0xff]  ;;  %v28_v14 = vld [vmem:[%s1065_s1 + $0x40] sm:$0xff] }
   0x4   :  { %655 = vmatpush3.bf16.msra.mxu0 %v654_v4  ;;  %679 = vmatpush3.bf16.msra.mxu1 %v654_v4  ;;  %v663_v13 = vpack.c.bf16 %v27_v12, %v26_v11  ;;  %v29_v15 = vld [vmem:[%s1065_s1 + $0x48] sm:$0xff]  ;;  %v30_v17 = vld [vmem:[%s1065_s1 + $0x50] sm:$0xff]  ;;  %v31_v18 = vld [vmem:[%s1065_s1 + $0x58] sm:$0xff] }
   0x5   :  { %656 = vmatprep.subr.bf16.mxu0 %v708_v0  ;;  %680 = vmatprep.subr.bf16.mxu1 %v708_v0  ;;  %v666_v16 = vpack.c.bf16 %v29_v15, %v28_v14  ;;  %v669_v19 = vpack.c.bf16 %v31_v18, %v30_v17  ;;  %v32_v20 = vld [vmem:[%s1065_s1 + $0x60] sm:$0xff]  ;;  %v33_v21 = vld [vmem:[%s1065_s1 + $0x68] sm:$0xff]  ;;  %v34_v23 = vld [vmem:[%s1065_s1 + $0x70] sm:$0xff] }
   0x6   :  { %v672_v22 = vpack.c.bf16 %v33_v21, %v32_v20  ;;  %v35_v24 = vld [vmem:[%s1065_s1 + $0x78] sm:$0xff]  ;;  %v51_v26 = vld [vmem:[%s1066_s0] sm:$0xff]  ;;  %v52_v28 = vld [vmem:[%s1066_s0 + $0x8] sm:$0xff] }
   0x7   :  { %v675_v25 = vpack.c.bf16 %v35_v24, %v34_v23  ;;  %v487_v27 = vld [vmem:[%s1066_s0 + $0x38] sm:$0xff]  ;;  %v488_v29 = vld [vmem:[%s1066_s0 + $0x40] sm:$0xff]  ;;  %v53_v30 = vld [vmem:[%s1066_s0 + $0x10] sm:$0xff] }
   0x8   :  { %658 = vmatpush3.bf16.msra.mxu0 %v657_v7  ;;  %682 = vmatpush3.bf16.msra.mxu1 %v657_v7  ;;  %v489_v31 = vld [vmem:[%s1066_s0 + $0x48] sm:$0xff]  ;;  %v54_v32 = vld [vmem:[%s1066_s0 + $0x18] sm:$0xff]  ;;  %v490_v33 = vld [vmem:[%s1066_s0 + $0x50] sm:$0xff] }
   0x9   :  { %659 = vmatprep.subr.bf16.mxu0 %v708_v0  ;;  %683 = vmatprep.subr.bf16.mxu1 %v708_v0  ;;  %v55_v34 = vld [vmem:[%s1066_s0 + $0x20] sm:$0xff]  ;;  %v491_v35 = vld [vmem:[%s1066_s0 + $0x58] sm:$0xff]  ;;  %v56_v36 = vld [vmem:[%s1066_s0 + $0x28] sm:$0xff] }
   0xa   :  { %v492_v37 = vld [vmem:[%s1066_s0 + $0x60] sm:$0xff]  ;;  %v57_v38 = vld [vmem:[%s1066_s0 + $0x30] sm:$0x1]  ;;  %v493_v39 = vld [vmem:[%s1066_s0 + $0x68] sm:$0x1] }
   0xb   :  { %v862_v40 = vld [vmem:[%s1067_s2] ss:$0 sm:$0xff] }
   0xc   :  { %661 = vmatpush3.bf16.msra.mxu0 %v660_v10  ;;  %685 = vmatpush3.bf16.msra.mxu1 %v660_v10 }
   0xd   :  { %662 = vmatprep.subr.bf16.mxu0 %v708_v0  ;;  %686 = vmatprep.subr.bf16.mxu1 %v708_v0 }
  0x10   :  { %664 = vmatpush3.bf16.msra.mxu0 %v663_v13  ;;  %688 = vmatpush3.bf16.msra.mxu1 %v663_v13 }
  0x11   :  { %665 = vmatprep.subr.bf16.mxu0 %v708_v0  ;;  %689 = vmatprep.subr.bf16.mxu1 %v708_v0 }
  0x14   :  { %667 = vmatpush3.bf16.msra.mxu0 %v666_v16  ;;  %691 = vmatpush3.bf16.msra.mxu1 %v666_v16 }
  0x15   :  { %668 = vmatprep.subr.bf16.mxu0 %v708_v0  ;;  %692 = vmatprep.subr.bf16.mxu1 %v708_v0 }
  0x18   :  { %670 = vmatpush3.bf16.msra.mxu0 %v669_v19  ;;  %694 = vmatpush3.bf16.msra.mxu1 %v669_v19 }
  0x19   :  { %671 = vmatprep.subr.bf16.mxu0 %v708_v0  ;;  %695 = vmatprep.subr.bf16.mxu1 %v708_v0 }
  0x1c   :  { %673 = vmatpush3.bf16.msra.mxu0 %v672_v22  ;;  %697 = vmatpush3.bf16.msra.mxu1 %v672_v22 }
  0x1d   :  { %674 = vmatprep.subr.bf16.mxu0 %v708_v0  ;;  %698 = vmatprep.subr.bf16.mxu1 %v708_v0 }
  0x20   :  { %676 = vmatpush3.bf16.msra.mxu0 %v675_v25  ;;  %700 = vmatpush3.bf16.msra.mxu1 %v675_v25 }
  0x23   :  { %580 = vmatmul.mubr.f32.vlgmr.msra.gmra.mrb[0].mxu0 %v51_v26  ;;  %633 = vmatmul.mubr.f32.vlgmr.msra.gmra.mrb[0].mxu1 %v487_v27 }
  0x24   :  { %582 = vmatprep.mubr.msk.f32.mxu0 %vm709_vm0, %v710_v6  ;;  %635 = vmatprep.mubr.msk.f32.mxu1 %vm709_vm0, %v710_v6 }
  0x27   :  { %583 = vmatmul.mubr.f32.gmra.mrb[2].mxu0 %v52_v28  ;;  %636 = vmatmul.mubr.f32.gmra.mrb[2].mxu1 %v488_v29 }
  0x28   :  { %585 = vmatprep.mubr.msk.f32.mxu0 %vm709_vm0, %v710_v6  ;;  %638 = vmatprep.mubr.msk.f32.mxu1 %vm709_vm0, %v710_v6 }
  0x2b   :  { %586 = vmatmul.mubr.f32.gmra.mrb[4].mxu0 %v53_v30  ;;  %639 = vmatmul.mubr.f32.gmra.mrb[4].mxu1 %v489_v31 }
  0x2c   :  { %588 = vmatprep.mubr.msk.f32.mxu0 %vm709_vm0, %v710_v6  ;;  %641 = vmatprep.mubr.msk.f32.mxu1 %vm709_vm0, %v710_v6 }
  0x2f   :  { %589 = vmatmul.mubr.f32.gmra.mrb[6].mxu0 %v54_v32  ;;  %642 = vmatmul.mubr.f32.gmra.mrb[6].mxu1 %v490_v33 }
  0x30   :  { %591 = vmatprep.mubr.msk.f32.mxu0 %vm709_vm0, %v710_v6  ;;  %644 = vmatprep.mubr.msk.f32.mxu1 %vm709_vm0, %v710_v6 }
  0x33   :  { %592 = vmatmul.mubr.f32.gmra.mrb[8].mxu0 %v55_v34  ;;  %645 = vmatmul.mubr.f32.gmra.mrb[8].mxu1 %v491_v35 }
  0x34   :  { %594 = vmatprep.mubr.msk.f32.mxu0 %vm709_vm0, %v710_v6  ;;  %647 = vmatprep.mubr.msk.f32.mxu1 %vm709_vm0, %v710_v6 }
  0x37   :  { %595 = vmatmul.mubr.f32.gmra.mrb[10].mxu0 %v56_v36  ;;  %648 = vmatmul.mubr.f32.gmra.mrb[10].mxu1 %v492_v37 }
  0x38   :  { %597 = vmatprep.mubr.msk.f32.mxu0 %vm709_vm0, %v710_v6  ;;  %650 = vmatprep.mubr.msk.f32.mxu1 %vm709_vm0, %v710_v6 }
  0x3b   :  { %598 = vmatmul.mubr.f32.gmra.mrb[12].mxu0 %v57_v38  ;;  %651 = vmatmul.mubr.f32.gmra.mrb[12].mxu1 %v493_v39 }
  0xf6   :  { %v130_v41 = vpop.f32.mrb[0].mxu0  ;;  %v343_v42 = vpop.f32.mrb[0].mxu1 }
  0xf7   :  { %v865_v43 = vadd.f32 %v862_v40, %v130_v41  ;;  %v868_v44 = vadd.f32 %v862_v40, %v343_v42  ;;  %v581_v45 = vpop.f32.mrb[1].mxu0  ;;  %v634_v46 = vpop.f32.mrb[1].mxu1 }
  0xf9   :  { %377 = vadd.xlane.f32.xlu1 %v868_v44  ;;  %164 = vadd.xlane.f32.xlu0 %v865_v43  ;;  %v392_v49 = vmul.f32 %v868_v44, %v868_v44  ;;  %v180_v50 = vmul.f32 %v865_v43, %v865_v43 }
  0xfa   :  { %v348_v47 = vpop.f32.mrb[2].mxu1  ;;  %v135_v48 = vpop.f32.mrb[2].mxu0 }
  0xfb   :  { %v584_v51 = vpop.f32.mrb[3].mxu0  ;;  %v637_v52 = vpop.f32.mrb[3].mxu1  ;;  %v877_v53 = vadd.f32 %v862_v40, %v348_v47  ;;  %v880_v54 = vadd.f32 %v862_v40, %v135_v48 }
  0xfd   :  { %399 = vadd.xlane.f32.xlu0 %v392_v49  ;;  %187 = vadd.xlane.f32.xlu1 %v180_v50  ;;  %v393_v61 = vmul.f32 %v877_v53, %v877_v53  ;;  %v181_v62 = vmul.f32 %v880_v54, %v880_v54 }
  0xfe   :  { %v353_v55 = vpop.f32.mrb[4].mxu1  ;;  %v140_v56 = vpop.f32.mrb[4].mxu0 }
  0xff   :  { %v587_v57 = vpop.f32.mrb[5].mxu0  ;;  %v640_v58 = vpop.f32.mrb[5].mxu1  ;;  %v889_v1 = vadd.f32 %v862_v40, %v353_v55  ;;  %v892_v2 = vadd.f32 %v862_v40, %v140_v56 }
 0x101   :  { %379 = vadd.xlane.f32.xlu1 %v877_v53  ;;  %166 = vadd.xlane.f32.xlu0 %v880_v54  ;;  %v182_v10 = vmul.f32 %v892_v2, %v892_v2  ;;  %v394_v16 = vmul.f32 %v889_v1, %v889_v1 }
 0x102   :  { %v145_v59 = vpop.f32.mrb[6].mxu0  ;;  %v358_v60 = vpop.f32.mrb[6].mxu1 }
 0x103   :  { %v590_v63 = vpop.f32.mrb[7].mxu0  ;;  %v643_v0 = vpop.f32.mrb[7].mxu1  ;;  %v897_v7 = vadd.f32 %v862_v40, %v145_v59  ;;  %v902_v13 = vadd.f32 %v862_v40, %v358_v60 }
 0x105   :  { %401 = vadd.xlane.f32.xlu1 %v393_v61  ;;  %189 = vadd.xlane.f32.xlu0 %v181_v62  ;;  %v183_v20 = vmul.f32 %v897_v7, %v897_v7  ;;  %v395_v22 = vmul.f32 %v902_v13, %v902_v13 }
 0x106   :  { %v150_v3 = vpop.f32.mrb[8].mxu0  ;;  %v363_v4 = vpop.f32.mrb[8].mxu1 }
 0x107   :  { %v593_v5 = vpop.f32.mrb[9].mxu0  ;;  %v646_v6 = vpop.f32.mrb[9].mxu1  ;;  %v909_v19 = vadd.f32 %v862_v40, %v150_v3  ;;  %v914_v21 = vadd.f32 %v862_v40, %v363_v4 }
 0x109   :  { %381 = vadd.xlane.f32.xlu1 %v889_v1  ;;  %168 = vadd.xlane.f32.xlu0 %v892_v2  ;;  %v184_v24 = vmul.f32 %v909_v19, %v909_v19  ;;  %v396_v26 = vmul.f32 %v914_v21, %v914_v21 }
 0x10a   :  { %v155_v8 = vpop.f32.mrb[10].mxu0  ;;  %v368_v9 = vpop.f32.mrb[10].mxu1 }
 0x10b   :  { %v596_v11 = vpop.f32.mrb[11].mxu0  ;;  %v649_v12 = vpop.f32.mrb[11].mxu1  ;;  %v921_v23 = vadd.f32 %v862_v40, %v155_v8  ;;  %v926_v25 = vadd.f32 %v862_v40, %v368_v9 }
 0x10d   :  { %191 = vadd.xlane.f32.xlu1 %v182_v10  ;;  %170 = vadd.xlane.f32.xlu0 %v897_v7  ;;  %v397_v29 = vmul.f32 %v926_v25, %v926_v25  ;;  %v185_v30 = vmul.f32 %v921_v23, %v921_v23 }
 0x10e   :  { %v160_v14 = vpop.f32.mrb[12].mxu0  ;;  %v373_v15 = vpop.f32.mrb[12].mxu1 }
 0x10f   :  { %v652_v17 = vpop.f32.mrb[13].mxu1  ;;  %v599_v18 = vpop.f32.mrb[13].mxu0  ;;  %v933_v27 = vadd.f32 %v862_v40, %v160_v14  ;;  %v936_v28 = vadd.f32 %v862_v40, %v373_v15 }
 0x111   :  { %403 = vadd.xlane.f32.xlu1 %v394_v16  ;;  %383 = vadd.xlane.f32.xlu0 %v902_v13  ;;  %v389_v31 = vsel %vm176_vm1, %v936_v28, 0.0  ;;  %v177_v32 = vsel %vm176_vm1, %v933_v27, 0.0  ;;  %v398_v33 = vmul.f32 %v936_v28, %v936_v28  ;;  %v186_v34 = vmul.f32 %v933_v27, %v933_v27 }
 0x113   :  { %v411_v35 = vsel %vm176_vm1, %v398_v33, 0.0  ;;  %v199_v36 = vsel %vm176_vm1, %v186_v34, 0.0 }
 0x115   :  { %193 = vadd.xlane.f32.xlu1 %v183_v20  ;;  %172 = vadd.xlane.f32.xlu0 %v909_v19 }
 0x119   :  { %405 = vadd.xlane.f32.xlu1 %v395_v22  ;;  %385 = vadd.xlane.f32.xlu0 %v914_v21 }
 0x11d   :  { %195 = vadd.xlane.f32.xlu1 %v184_v24  ;;  %174 = vadd.xlane.f32.xlu0 %v921_v23 }
 0x121   :  { %407 = vadd.xlane.f32.xlu1 %v396_v26  ;;  %387 = vadd.xlane.f32.xlu0 %v926_v25 }
 0x125   :  { %409 = vadd.xlane.f32.xlu1 %v397_v29  ;;  %197 = vadd.xlane.f32.xlu0 %v185_v30 }
 0x129   :  { %390 = vadd.xlane.f32.xlu1 %v389_v31  ;;  %178 = vadd.xlane.f32.xlu0 %v177_v32 }
 0x12d   :  { %412 = vadd.xlane.f32.xlu1 %v411_v35  ;;  %200 = vadd.xlane.f32.xlu0 %v199_v36 }
 0x186   :  { %v378_v37 = vpop.xlane.xlu1 %377  ;;  %v165_v38 = vpop.xlane.xlu0 %164 }
 0x18a   :  { %v400_v39 = vpop.xlane.xlu0 %399  ;;  %v188_v40 = vpop.xlane.xlu1 %187 }
 0x18e   :  { %v380_v41 = vpop.xlane.xlu1 %379  ;;  %v167_v42 = vpop.xlane.xlu0 %166 }
 0x18f   :  { %v414_v61 = vadd.f32 %v380_v41, %v378_v37  ;;  %v202_v62 = vadd.f32 %v167_v42, %v165_v38 }
 0x192   :  { %v402_v45 = vpop.xlane.xlu1 %401  ;;  %v190_v46 = vpop.xlane.xlu0 %189 }
 0x193   :  { %v428_v5 = vadd.f32 %v402_v45, %v400_v39  ;;  %v216_v6 = vadd.f32 %v190_v46, %v188_v40 }
 0x196   :  { %v382_v47 = vpop.xlane.xlu1 %381  ;;  %v169_v48 = vpop.xlane.xlu0 %168 }
 0x197   :  { %v415_v3 = vadd.f32 %v414_v61, %v382_v47  ;;  %v203_v4 = vadd.f32 %v202_v62, %v169_v48 }
 0x19a   :  { %v192_v49 = vpop.xlane.xlu1 %191  ;;  %v171_v50 = vpop.xlane.xlu0 %170 }
 0x19b   :  { %v204_v8 = vadd.f32 %v203_v4, %v171_v50  ;;  %v217_v12 = vadd.f32 %v216_v6, %v192_v49 }
 0x19e   :  { %v404_v51 = vpop.xlane.xlu1 %403  ;;  %v384_v52 = vpop.xlane.xlu0 %383 }
 0x19f   :  { %v416_v9 = vadd.f32 %v415_v3, %v384_v52  ;;  %v429_v14 = vadd.f32 %v428_v5, %v404_v51 }
 0x1a2   :  { %v194_v55 = vpop.xlane.xlu1 %193  ;;  %v173_v56 = vpop.xlane.xlu0 %172 }
 0x1a3   :  { %v205_v15 = vadd.f32 %v204_v8, %v173_v56  ;;  %v218_v17 = vadd.f32 %v217_v12, %v194_v55 }
 0x1a6   :  { %v406_v57 = vpop.xlane.xlu1 %405  ;;  %v386_v58 = vpop.xlane.xlu0 %385 }
 0x1a7   :  { %v417_v16 = vadd.f32 %v416_v9, %v386_v58  ;;  %v430_v18 = vadd.f32 %v429_v14, %v406_v57 }
 0x1aa   :  { %v196_v59 = vpop.xlane.xlu1 %195  ;;  %v175_v60 = vpop.xlane.xlu0 %174 }
 0x1ab   :  { %v206_v20 = vadd.f32 %v205_v15, %v175_v60  ;;  %v219_v31 = vadd.f32 %v218_v17, %v196_v59 }
 0x1ae   :  { %v408_v63 = vpop.xlane.xlu1 %407  ;;  %v388_v0 = vpop.xlane.xlu0 %387 }
 0x1af   :  { %v418_v22 = vadd.f32 %v417_v16, %v388_v0  ;;  %v431_v32 = vadd.f32 %v430_v18, %v408_v63 }
 0x1b2   :  { %v410_v10 = vpop.xlane.xlu1 %409  ;;  %v198_v11 = vpop.xlane.xlu0 %197 }
 0x1b3   :  { %v432_v35 = vadd.f32 %v431_v32, %v410_v10  ;;  %v220_v36 = vadd.f32 %v219_v31, %v198_v11 }
 0x1b6   :  { %v391_v24 = vpop.xlane.xlu1 %390  ;;  %v179_v26 = vpop.xlane.xlu0 %178 }
 0x1b7   :  { %v419_v29 = vsel %vm176_vm1, %v391_v24, 0.0  ;;  %v207_v30 = vsel %vm176_vm1, %v179_v26, 0.0 }
 0x1b8   :  { %v420_v33 = vadd.f32 %v419_v29, %v418_v22  ;;  %v208_v34 = vadd.f32 %v207_v30, %v206_v20 }
 0x1ba   :  { %v421_v37 = vrot.slane %v420_v33, 4  ;;  %v209_v38 = vrot.slane %v208_v34, 4  ;;  %v413_v39 = vpop.xlane.xlu1 %412  ;;  %v201_v40 = vpop.xlane.xlu0 %200 }
 0x1bb   :  { %v433_v41 = vsel %vm176_vm1, %v413_v39, 0.0  ;;  %v221_v42 = vsel %vm176_vm1, %v201_v40, 0.0 }
 0x1bc   :  { %v422_v45 = vadd.f32 %v421_v37, %v420_v33  ;;  %v210_v46 = vadd.f32 %v209_v38, %v208_v34  ;;  %v434_v47 = vadd.f32 %v433_v41, %v432_v35  ;;  %v222_v48 = vadd.f32 %v221_v42, %v220_v36  ;;  %v45_v41 = vld [vmem:[%s1069_s4 + $0x8] sm:$0xff]  ;;  %v46_v42 = vld [vmem:[%s1069_s4 + $0x10] sm:$0xff] }
 0x1be   :  { %v423_v49 = vrot.slane %v422_v45, 2  ;;  %v211_v50 = vrot.slane %v210_v46, 2  ;;  %v435_v51 = vrot.slane %v434_v47, 4  ;;  %v223_v52 = vrot.slane %v222_v48, 4 }
 0x1c0   :  { %v424_v55 = vadd.f32 %v423_v49, %v422_v45  ;;  %v212_v56 = vadd.f32 %v211_v50, %v210_v46  ;;  %v436_v57 = vadd.f32 %v435_v51, %v434_v47  ;;  %v224_v58 = vadd.f32 %v223_v52, %v222_v48  ;;  %v47_v45 = vld [vmem:[%s1069_s4 + $0x18] sm:$0xff]  ;;  %v48_v50 = vld [vmem:[%s1069_s4 + $0x20] sm:$0xff]  ;;  %v49_v51 = vld [vmem:[%s1069_s4 + $0x28] sm:$0xff] }
 0x1c1   :  { %v50_v52 = vld [vmem:[%s1069_s4 + $0x30] sm:$0x1] }
 0x1c2   :  { %v425_v59 = vrot.slane %v424_v55, 1  ;;  %v213_v60 = vrot.slane %v212_v56, 1  ;;  %v437_v61 = vrot.slane %v436_v57, 2  ;;  %v225_v62 = vrot.slane %v224_v58, 2 }
 0x1c4   :  { %v438_v63 = vadd.f32 %v437_v61, %v436_v57  ;;  %v226_v0 = vadd.f32 %v225_v62, %v224_v58  ;;  %v426_v3 = vadd.f32 %v425_v59, %v424_v55  ;;  %v214_v4 = vadd.f32 %v213_v60, %v212_v56 }
 0x1c6   :  { %v439_v5 = vrot.slane %v438_v63, 1  ;;  %v227_v6 = vrot.slane %v226_v0, 1  ;;  %v427_v8 = vmul.f32 0.00015943877, %v426_v3  ;;  %v956_v9 = vmul.f32 0.00015943877, %v214_v4 }
 0x1c8   :  { %v440_v10 = vadd.f32 %v439_v5, %v438_v63  ;;  %v228_v11 = vadd.f32 %v227_v6, %v226_v0  ;;  %v442_v14 = vmul.f32 %v427_v8, %v427_v8  ;;  %v230_v15 = vmul.f32 %v956_v9, %v956_v9 }
 0x1c9   :  { %v446_v24 = vsub.f32 %v868_v44, %v427_v8  ;;  %v447_v26 = vsub.f32 %v877_v53, %v427_v8  ;;  %v448_v29 = vsub.f32 %v889_v1, %v427_v8  ;;  %v449_v30 = vsub.f32 %v902_v13, %v427_v8  ;;  %v37_v53 = vld [vmem:[%s1068_s3] sm:$0xff]  ;;  %v38_v1 = vld [vmem:[%s1068_s3 + $0x8] sm:$0xff] }
 0x1ca   :  { %v441_v12 = vmul.f32 0.00015943877, %v440_v10  ;;  %v229_v16 = vmul.f32 0.00015943877, %v228_v11  ;;  %v450_v31 = vsub.f32 %v914_v21, %v427_v8  ;;  %v451_v32 = vsub.f32 %v926_v25, %v427_v8  ;;  %v39_v25 = vld [vmem:[%s1068_s3 + $0x10] sm:$0xff] }
 0x1cb   :  { %v452_v33 = vsub.f32 %v936_v28, %v427_v8  ;;  %v234_v34 = vsub.f32 %v865_v43, %v956_v9  ;;  %v235_v35 = vsub.f32 %v880_v54, %v956_v9  ;;  %v236_v44 = vsub.f32 %v892_v2, %v956_v9  ;;  %v40_v28 = vld [vmem:[%s1068_s3 + $0x18] sm:$0xff] }
 0x1cc   :  { %v443_v17 = vsub.f32 %v441_v12, %v442_v14  ;;  %v231_v18 = vsub.f32 %v229_v16, %v230_v15  ;;  %v237_v21 = vsub.f32 %v897_v7, %v956_v9  ;;  %v238_v43 = vsub.f32 %v909_v19, %v956_v9  ;;  %v41_v7 = vld [vmem:[%s1068_s3 + $0x20] sm:$0xff]  ;;  %v42_v19 = vld [vmem:[%s1068_s3 + $0x28] sm:$0xff] }
 0x1cd   :  { %v239_v54 = vsub.f32 %v921_v23, %v956_v9  ;;  %v240_v2 = vsub.f32 %v933_v27, %v956_v9  ;;  %v43_v23 = vld [vmem:[%s1068_s3 + $0x30] sm:$0x1]  ;;  %v44_v27 = vld [vmem:[%s1069_s4] sm:$0xff] }
 0x1ce   :  { %v444_v20 = vadd.f32 1e-05, %v443_v17  ;;  %v232_v22 = vadd.f32 1e-05, %v231_v18 }
 0x1d0   :  { %704 = vrsqrt.f32 %v444_v20 }
 0x1d1   :  { %706 = vrsqrt.f32 %v232_v22 }
 0x1da   :  { %v705_v13 = vpop.eup %704 }
 0x1db   :  { %v707_v36 = vpop.eup %706  ;;  %v453_v37 = vmul.f32 %v705_v13, %v446_v24  ;;  %v454_v38 = vmul.f32 %v705_v13, %v447_v26  ;;  %v455_v39 = vmul.f32 %v705_v13, %v448_v29  ;;  %v456_v40 = vmul.f32 %v705_v13, %v449_v30 }
 0x1dc   :  { %v457_v46 = vmul.f32 %v705_v13, %v450_v31  ;;  %v458_v47 = vmul.f32 %v705_v13, %v451_v32  ;;  %v459_v48 = vmul.f32 %v705_v13, %v452_v33  ;;  %v241_v49 = vmul.f32 %v707_v36, %v234_v34 }
 0x1dd   :  { %v460_v55 = vmul.f32 %v453_v37, %v37_v53  ;;  %v461_v56 = vmul.f32 %v454_v38, %v38_v1  ;;  %v462_v57 = vmul.f32 %v455_v39, %v39_v25  ;;  %v463_v58 = vmul.f32 %v456_v40, %v40_v28 }
 0x1de   :  { %v464_v59 = vmul.f32 %v457_v46, %v41_v7  ;;  %v465_v60 = vmul.f32 %v458_v47, %v42_v19  ;;  %v466_v61 = vmul.f32 %v459_v48, %v43_v23  ;;  %v242_v62 = vmul.f32 %v707_v36, %v235_v35 }
 0x1df   :  { %v467_v63 = vadd.f32 %v460_v55, %v44_v27  ;;  %v468_v0 = vadd.f32 %v461_v56, %v45_v41  ;;  %v469_v3 = vadd.f32 %v462_v57, %v46_v42  ;;  %v470_v4 = vadd.f32 %v463_v58, %v47_v45 }
 0x1e0   :  { %v471_v5 = vadd.f32 %v464_v59, %v48_v50  ;;  %v472_v6 = vadd.f32 %v465_v60, %v49_v51  ;;  %v473_v8 = vadd.f32 %v466_v61, %v50_v52  ;;  %v243_v9 = vmul.f32 %v707_v36, %v236_v44 }
 0x1e1   :  { %494 = vst [vmem:[%s1070_s5 + $0x38] sm:$0xff] %v467_v63  ;;  %495 = vst [vmem:[%s1070_s5 + $0x40] sm:$0xff] %v468_v0  ;;  %v244_v10 = vmul.f32 %v707_v36, %v237_v21  ;;  %v245_v11 = vmul.f32 %v707_v36, %v238_v43  ;;  %v246_v12 = vmul.f32 %v707_v36, %v239_v54 }
 0x1e2   :  { %496 = vst [vmem:[%s1070_s5 + $0x48] sm:$0xff] %v469_v3  ;;  %497 = vst [vmem:[%s1070_s5 + $0x50] sm:$0xff] %v470_v4  ;;  %v247_v14 = vmul.f32 %v707_v36, %v240_v2  ;;  %v248_v15 = vmul.f32 %v241_v49, %v37_v53  ;;  %v249_v16 = vmul.f32 %v242_v62, %v38_v1 }
 0x1e3   :  { %498 = vst [vmem:[%s1070_s5 + $0x58] sm:$0xff] %v471_v5  ;;  %499 = vst [vmem:[%s1070_s5 + $0x60] sm:$0xff] %v472_v6  ;;  %v250_v17 = vmul.f32 %v243_v9, %v39_v25  ;;  %v251_v18 = vmul.f32 %v244_v10, %v40_v28  ;;  %v252_v20 = vmul.f32 %v245_v11, %v41_v7 }
 0x1e4   :  { %500 = vst [vmem:[%s1070_s5 + $0x68] sm:$0x1] %v473_v8  ;;  %v253_v22 = vmul.f32 %v246_v12, %v42_v19  ;;  %v254_v24 = vmul.f32 %v247_v14, %v43_v23  ;;  %v255_v26 = vadd.f32 %v248_v15, %v44_v27  ;;  %v256_v29 = vadd.f32 %v249_v16, %v45_v41 }
 0x1e5   :  { %v257_v30 = vadd.f32 %v250_v17, %v46_v42  ;;  %v258_v31 = vadd.f32 %v251_v18, %v47_v45  ;;  %v259_v32 = vadd.f32 %v252_v20, %v48_v50 }
 0x1e6   :  { %v260_v33 = vadd.f32 %v253_v22, %v49_v51  ;;  %v261_v34 = vadd.f32 %v254_v24, %v50_v52  ;;  %262 = vst [vmem:[%s1070_s5] sm:$0xff] %v255_v26  ;;  %263 = vst [vmem:[%s1070_s5 + $0x8] sm:$0xff] %v256_v29 }
 0x1e7   :  { %264 = vst [vmem:[%s1070_s5 + $0x10] sm:$0xff] %v257_v30  ;;  %265 = vst [vmem:[%s1070_s5 + $0x18] sm:$0xff] %v258_v31 }
 0x1e8   :  { %266 = vst [vmem:[%s1070_s5 + $0x20] sm:$0xff] %v259_v32  ;;  %267 = vst [vmem:[%s1070_s5 + $0x28] sm:$0xff] %v260_v33 }
 0x1e9   :  { %268 = vst [vmem:[%s1070_s5 + $0x30] sm:$0x1] %v261_v34 }

</bundles_post_ra>
